<compile_context>
chip_gen: v5e
topology: v5e:2x2
jax: 0.10.0
libtpu: 0.0.40
codegen_flags: <defaults>
</compile_context>

<pallas_src>
import functools

import jax
import jax.numpy as jnp
from jax.experimental import pallas as pl
from jax.experimental.pallas import tpu as pltpu


def _silu(x):
    return x * jax.nn.sigmoid(x)


def _round_up(a, m):
    return -(-a // m) * m


def _tpu_defaults():
    """Per-generation VMEM limit / row-tile defaults / weight-residency budget."""
    try:
        kind = jax.devices()[0].device_kind.lower()
    except Exception:  # pragma: no cover - defensive
        kind = ""
    if "v5 lite" in kind or "v5e" in kind or "v5litepod" in kind:
        # v5e: 128 MiB VMEM, compute/HBM balance point ~240 rows.
        return dict(gen=5, vmem_limit=96 << 20, tm_rows=512, resident_budget=48 << 20)
    if "v5p" in kind or "v4" in kind:
        return dict(gen=4, vmem_limit=96 << 20, tm_rows=512, resident_budget=48 << 20)
    if "v6" in kind or "trillium" in kind:
        # v6e: 128 MiB VMEM; TM ~ 1024 hides the per-layer weight stream.
        return dict(gen=6, vmem_limit=100 << 20, tm_rows=1024, resident_budget=48 << 20)
    if "7" in kind:
        # v7x: only 64 MiB VMEM per TensorCore, 2 TCs per chip.
        return dict(gen=7, vmem_limit=52 << 20, tm_rows=320, resident_budget=20 << 20)
    return dict(gen=0, vmem_limit=64 << 20, tm_rows=512, resident_budget=32 << 20)


def mhba_fused_kernel(x_ref, mem0_ref, wqkv_ref, c_ref, ug_ref, w1_ref, w2_ref,
                      out_ref, mem_sc, *, head_dim, hidden, resident):
    """All layers of MHBAMixerV2 for one tile of (batch*seq) rows.

    Grid = (row_tiles, n_layers); the layer axis is innermost / "arbitrary".

    x_ref, out_ref : (TM, H) f32, H = lane-padded hidden (= n_heads*head_dim + pad)
    mem0_ref       : (1, H) f32 initial memory (tiled over heads, zero in pad lanes)
    wqkv_ref       : (L|1, H, 3H) bf16  [Wq^T@Tri | Wk^T*(1-fg) | Wv^T] block-diag
    c_ref, ug_ref  : (L|1, 1, H) f32 gate vectors (c = fg*(2-fg))
    w1_ref, w2_ref : (L|1, H, 2H) / (L|1, 2H, H) bf16 KAN base weights
    mem_sc         : (TM, H) f32 recurrent memory, resident across layers
    The activation itself is carried in out_ref (block index is layer-invariant,
    so it stays resident in VMEM across the layer axis and is written back once).
    """
    layer = pl.program_id(1)
    widx = layer if resident else 0

    @pl.when(layer == 0)
    def _():
        out_ref[...] = x_ref[...]
        mem_sc[...] = jnp.broadcast_to(mem0_ref[...], mem_sc.shape)

    x = out_ref[...]                     # (TM, H) f32, previous layer's activation
    mem = mem_sc[...]                    # (TM, H) f32
    x_bf = x.astype(jnp.bfloat16)

    # Fused Q/K/V projection: one N=3H MXU pass.  The within-head cumsum is
    # pre-folded into the Q columns and the (1-fg) gate into the K columns.
    qkv = jnp.dot(x_bf, wqkv_ref[widx], preferred_element_type=jnp.float32)
    q = qkv[:, :hidden]                 # already cumsum'ed along head_dim
    ka = qkv[:, hidden:2 * hidden]      # (1-fg) * keys
    v = qkv[:, 2 * hidden:]

    c = c_ref[widx]                     # (1, H) == fg * (2 - fg)
    ug = ug_ref[widx]                   # (1, H)

    # MHBAMixerV2MemoryMixer, exact algebraic form:
    #   cur_mem = (1-fg)*(k*v) + fg*(2-fg)*mem
    cur_mem = ka * v + c * mem

    # cumsum along head_dim: masked Hillis-Steele prefix scan on the lane axis
    # (pltpu.roll lands on the XLU slot; the mask keeps it within each head).
    pos = jax.lax.broadcasted_iota(jnp.int32, (1, hidden), 1) % head_dim
    cm_cs = cur_mem
    s = 1
    while s < head_dim:
        mask = (pos >= s).astype(cm_cs.dtype)          # (1, H)
        cm_cs = cm_cs + pltpu.roll(cm_cs, shift=s, axis=1) * mask
        s *= 2

    cell = jnp.tanh((q + cm_cs) * ug + x)

    # tokenMixingKAN([hd, 2*hd, hd]) -- base SiLU-linear path.
    # TODO(synk): spline term of efficient-KAN omitted (KAN class not provided in source).
    h1 = jnp.dot(_silu(cell).astype(jnp.bfloat16), w1_ref[widx],
                 preferred_element_type=jnp.float32)
    kan = jnp.dot(_silu(h1).astype(jnp.bfloat16), w2_ref[widx],
                  preferred_element_type=jnp.float32)

    # Carry activation (out_ref) + memory (scratch) in VMEM to the next layer.
    out_ref[...] = jnp.tanh(kan + cell)
    mem_sc[...] = cm_cs


def mhba_layers_pallas(x2d, mem0, params, *, head_dim, cfg):
    """x2d: (rows, H_pad) f32, mem0: (1, H_pad) f32. Returns (rows, H_pad) f32."""
    rows, hp = x2d.shape
    n_layers = params["wqkv"].shape[0]
    gen = cfg["gen"]

    # bf16 bytes of one layer's matmul weights (qkv + KAN w1 + KAN w2).
    wbytes_layer = 2 * (3 * hp * hp + 2 * hp * hp + 2 * hp * hp)
    # Make all layers' weights VMEM-resident (fetched once) if they fit the budget
    # (budget already assumes the double-buffer Pallas allocates per input).
    resident = 2 * n_layers * wbytes_layer <= cfg["resident_budget"]

    rows8 = _round_up(rows, 8)
    tm = min(_round_up(cfg["tm_rows"], 8), rows8)
    if gen == 7 and rows8 >= 16:
        # keep both v7x TensorCores busy: at least 2 row tiles.
        tm = min(tm, _round_up(-(-rows8 // 2), 8))

    def vmem_est(tm_):
        w = (2 * n_layers if resident else 2) * wbytes_layer
        io = 4 * tm_ * hp * 4                 # x + out, double-buffered f32
        scratch = tm_ * hp * 4                # resident memory state
        temps = tm_ * (3 * hp + 2 * hp + 8 * hp) * 4   # qkv, h1, live f32 temps
        return w + io + scratch + temps + (1 << 20)

    while tm > 8 and vmem_est(tm) > 0.9 * cfg["vmem_limit"]:
        tm = max(8, _round_up(tm // 2, 8))

    rows_pad = _round_up(rows, tm)
    if rows_pad != rows:
        x2d = jnp.pad(x2d, ((0, rows_pad - rows), (0, 0)))
    n_tiles = rows_pad // tm

    if resident:
        # Full-extent blocks with a constant index -> DMA'd once, never re-streamed.
        wqkv_spec = pl.BlockSpec((n_layers, hp, 3 * hp), lambda i, l: (0, 0, 0))
        gate_spec = pl.BlockSpec((n_layers, 1, hp), lambda i, l: (0, 0, 0))
        w1_spec = pl.BlockSpec((n_layers, hp, 2 * hp), lambda i, l: (0, 0, 0))
        w2_spec = pl.BlockSpec((n_layers, 2 * hp, hp), lambda i, l: (0, 0, 0))
    else:
        # Streamed: one layer's weights per inner grid step.
        wqkv_spec = pl.BlockSpec((1, hp, 3 * hp), lambda i, l: (l, 0, 0))
        gate_spec = pl.BlockSpec((1, 1, hp), lambda i, l: (l, 0, 0))
        w1_spec = pl.BlockSpec((1, hp, 2 * hp), lambda i, l: (l, 0, 0))
        w2_spec = pl.BlockSpec((1, 2 * hp, hp), lambda i, l: (l, 0, 0))

    in_specs = [
        pl.BlockSpec((tm, hp), lambda i, l: (i, 0)),     # activation rows
        pl.BlockSpec((1, hp), lambda i, l: (0, 0)),      # initial memory row
        wqkv_spec,
        gate_spec,                                       # c = fg*(2-fg)
        gate_spec,                                       # update gate
        w1_spec,
        w2_spec,
    ]
    out_specs = pl.BlockSpec((tm, hp), lambda i, l: (i, 0))

    kernel = functools.partial(mhba_fused_kernel, head_dim=head_dim,
                               hidden=hp, resident=resident)

    fn = pl.pallas_call(
        kernel,
        out_shape=jax.ShapeDtypeStruct((rows_pad, hp), jnp.float32),
        grid_spec=pltpu.PrefetchScalarGridSpec(
            num_scalar_prefetch=0,
            grid=(n_tiles, n_layers),
            in_specs=in_specs,
            out_specs=out_specs,
            scratch_shapes=[pltpu.VMEM((tm, hp), jnp.float32)],   # recurrent memory
        ),
        compiler_params=pltpu.CompilerParams(
            dimension_semantics=("parallel", "arbitrary"),
            vmem_limit_bytes=int(cfg["vmem_limit"]),
        ),
    )
    out = fn(x2d, mem0,
             params["wqkv"], params["c_gate"], params["ug"],
             params["w1"], params["w2"])
    return out[:rows]


def init_params(key, n_layers, hidden_dim, n_heads):
    """Raw per-layer params in PyTorch (out_features, in_features) orientation."""
    hd = hidden_dim // n_heads
    layers = []
    for _ in range(n_layers):
        key, k0, k1, k2, k3, k4, k5, k6 = jax.random.split(key, 8)
        scale = 1.0 / jnp.sqrt(jnp.float32(hd))
        layers.append(dict(
            wq=jax.random.normal(k0, (hd, hd), jnp.float32) * scale,
            wk=jax.random.normal(k1, (hd, hd), jnp.float32) * scale,
            wv=jax.random.normal(k2, (hd, hd), jnp.float32) * scale,
            fg=jax.random.normal(k3, (hd,), jnp.float32),      # forget_gate (raw, no sigmoid — matches reference)
            ug=jax.random.normal(k4, (hd,), jnp.float32),      # update_gate
            kan_w1=jax.random.normal(k5, (2 * hd, hd), jnp.float32) * scale,
            kan_w2=jax.random.normal(k6, (hd, 2 * hd), jnp.float32)
                   * (1.0 / jnp.sqrt(jnp.float32(2 * hd))),
        ))
    key, km = jax.random.split(key)
    memorys = jax.random.normal(km, (hd,), jnp.float32)        # MHBAMixerV2.memorys
    return layers, memorys


def prepare_packed_params(layers, memorys, n_heads):
    """Stacked, head-packed (block-diagonal), lane-padded, bf16 kernel weights."""
    hd = layers[0]["wq"].shape[0]
    hidden = hd * n_heads
    hp = _round_up(hidden, 128)                       # lane-dense padded hidden
    eye = jnp.eye(n_heads, dtype=jnp.float32)
    tri_hd = jnp.triu(jnp.ones((hd, hd), jnp.float32))   # cumsum-as-matmul matrix

    def pad2(w, r, c):
        return jnp.pad(w, ((0, r - w.shape[0]), (0, c - w.shape[1])))

    def pad1(v, n):
        return jnp.pad(v, (0, n - v.shape[0]))

    def pack(p):
        fg = jnp.tile(p["fg"], n_heads)
        a = 1.0 - fg                                  # exact: cur_mem = a*k*v + c*mem
        c = fg * (2.0 - fg)
        ug = jnp.tile(p["ug"], n_heads)
        wq_cs = jnp.kron(eye, p["wq"].T @ tri_hd)     # fuse head-dim cumsum into Wq
        wk_a = jnp.kron(eye, p["wk"].T) * a[None, :]  # fuse (1-fg) gate into Wk cols
        wv = jnp.kron(eye, p["wv"].T)
        wqkv = jnp.concatenate(
            [pad2(wq_cs, hp, hp), pad2(wk_a, hp, hp), pad2(wv, hp, hp)], axis=1)
        w1 = pad2(jnp.kron(eye, p["kan_w1"].T), hp, 2 * hp)
        w2 = pad2(jnp.kron(eye, p["kan_w2"].T), 2 * hp, hp)
        return wqkv, pad1(c, hp), pad1(ug, hp), w1, w2

    packed = [pack(p) for p in layers]
    stack = lambda idx, dt: jnp.stack([pp[idx] for pp in packed]).astype(dt)

    params = dict(
        wqkv=stack(0, jnp.bfloat16),                  # (L, Hp, 3Hp)
        c_gate=stack(1, jnp.float32)[:, None, :],     # (L, 1, Hp)
        ug=stack(2, jnp.float32)[:, None, :],         # (L, 1, Hp)
        w1=stack(3, jnp.bfloat16),                    # (L, Hp, 2Hp)
        w2=stack(4, jnp.bfloat16),                    # (L, 2Hp, Hp)
    )
    mem0 = pad1(jnp.tile(memorys, n_heads), hp)[None, :].astype(jnp.float32)
    return params, mem0, hidden, hp


def mhba_mixer_v2_forward(inputs_, params, mem0, *, hidden, hidden_pad, head_dim, cfg):
    """inputs_: (B, S, hidden_dim) float32."""
    b, s, _ = inputs_.shape

    # fourier_transform: real part of FFT along the last dim (plain-JAX glue).
    tm = jnp.fft.fft(inputs_, n=hidden, axis=-1).real.astype(jnp.float32)

    # Head-packed, lane-padded row layout (B*S, Hp) kept for all layers.
    x2d = tm.reshape(b * s, hidden)
    x2d = jnp.pad(x2d, ((0, 0), (0, hidden_pad - hidden)))
    out2d = mhba_layers_pallas(x2d, mem0, params, head_dim=head_dim, cfg=cfg)
    out = out2d[:, :hidden].reshape(b, s, hidden)

    # reverse_fourier_transform: real part of IFFT along the last dim.
    return jnp.fft.ifft(out, n=hidden, axis=-1).real.astype(jnp.float32)


def mhba_reference(inputs_, layers, memorys, n_heads):
    """Pure-JAX f32 reference of the PyTorch forward (KAN base path only)."""
    b, s, h = inputs_.shape
    hd = h // n_heads
    x = jnp.fft.fft(inputs_, n=h, axis=-1).real.astype(jnp.float32)
    mem = memorys
    for p in layers:
        xp = x.reshape(b, s, n_heads, hd).transpose(0, 2, 1, 3)    # (b, h, s, hd)
        q = jnp.einsum("bhsd,ed->bhse", xp, p["wq"]).cumsum(-1)
        k = jnp.einsum("bhsd,ed->bhse", xp, p["wk"])
        v = jnp.einsum("bhsd,ed->bhse", xp, p["wv"])
        fg = p["fg"]
        cur_cell = k * v + fg * mem
        cur_mem = ((1.0 - fg) * cur_cell + fg * mem).cumsum(-1)
        cell = jnp.tanh((q + cur_mem) * p["ug"] + xp)
        h1 = jnp.einsum("bhsd,ed->bhse", jax.nn.silu(cell), p["kan_w1"])
        kan = jnp.einsum("bhsd,ed->bhse", jax.nn.silu(h1), p["kan_w2"])
        tmx = jnp.tanh(kan + cell)
        x = tmx.transpose(0, 2, 1, 3).reshape(b, s, h)
        mem = cur_mem
    return jnp.fft.ifft(x, n=h, axis=-1).real.astype(jnp.float32)


if __name__ == "__main__":
    n_layers = 2
    batch = 2
    seq = 8
    hidden_dim = 32
    n_heads = 4
    head_dim = hidden_dim // n_heads

    key = jax.random.PRNGKey(0)
    k_x, k_p = jax.random.split(key)
    x = 0.05 * jax.random.normal(k_x, (batch, seq, hidden_dim), jnp.float32)
    layers, memorys = init_params(k_p, n_layers, hidden_dim, n_heads)
    params, mem0, hidden, hidden_pad = prepare_packed_params(layers, memorys, n_heads)
    cfg = _tpu_defaults()

    fwd = jax.jit(functools.partial(mhba_mixer_v2_forward, hidden=hidden,
                                    hidden_pad=hidden_pad, head_dim=head_dim, cfg=cfg))
    out = jax.block_until_ready(fwd(x, params, mem0))

    assert out.shape == (batch, seq, hidden_dim), out.shape
    assert out.dtype == jnp.float32
    assert bool(jnp.all(jnp.isfinite(out)))

    ref = mhba_reference(x, layers, memorys, n_heads)
    max_err = float(jnp.max(jnp.abs(out - ref)))
    assert max_err < 2.5e-2, f"kernel vs reference max abs err = {max_err}"
    print("KERNEL_OK")
</pallas_src>

<mosaic_0001>
module attributes {stable_mosaic.version = 11 : i64} {
  func.func @mhba_fused_kernel(%arg0: i32, %arg1: i32, %arg2: memref<16x128xf32, #tpu.memory_space<vmem>>, %arg3: memref<1x128xf32, #tpu.memory_space<vmem>>, %arg4: memref<2x128x384xbf16, #tpu.memory_space<vmem>>, %arg5: memref<2x1x128xf32, #tpu.memory_space<vmem>>, %arg6: memref<2x1x128xf32, #tpu.memory_space<vmem>>, %arg7: memref<2x128x256xbf16, #tpu.memory_space<vmem>>, %arg8: memref<2x256x128xbf16, #tpu.memory_space<vmem>>, %arg9: memref<16x128xf32, #tpu.memory_space<vmem>>, %arg10: memref<16x128xf32, #tpu.memory_space<vmem>>) attributes {dimension_semantics = [#tpu.dimension_semantics<parallel>, #tpu.dimension_semantics<arbitrary>], iteration_bounds = array<i64: 1, 2>, scalar_prefetch = 0 : i64, scratch_operands = 1 : i64, tpu.core_type = #tpu.core_type<tc>, window_params = [{transform_indices = @transform_0, window_bounds = array<i64: 16, 128>}, {pipeline_mode = #tpu.pipeline_mode<synchronous>, transform_indices = @transform_1, window_bounds = array<i64: 1, 128>}, {pipeline_mode = #tpu.pipeline_mode<synchronous>, transform_indices = @transform_2, window_bounds = array<i64: 2, 128, 384>}, {pipeline_mode = #tpu.pipeline_mode<synchronous>, transform_indices = @transform_3, window_bounds = array<i64: 2, 1, 128>}, {pipeline_mode = #tpu.pipeline_mode<synchronous>, transform_indices = @transform_4, window_bounds = array<i64: 2, 1, 128>}, {pipeline_mode = #tpu.pipeline_mode<synchronous>, transform_indices = @transform_5, window_bounds = array<i64: 2, 128, 256>}, {pipeline_mode = #tpu.pipeline_mode<synchronous>, transform_indices = @transform_6, window_bounds = array<i64: 2, 256, 128>}, {transform_indices = @transform_7, window_bounds = array<i64: 16, 128>}]} {
    %c0_i32 = arith.constant 0 : i32
    %0 = arith.cmpi eq, %arg1, %c0_i32 : i32
    %1 = arith.extui %0 : i1 to i32
    %c0_i32_0 = arith.constant 0 : i32
    %2 = arith.cmpi ne, %1, %c0_i32_0 : i32
    scf.if %2 {
      %c0_30 = arith.constant 0 : index
      %c0_31 = arith.constant 0 : index
      %95 = vector.load %arg2[%c0_30, %c0_31] : memref<16x128xf32, #tpu.memory_space<vmem>>, vector<16x128xf32>
      %c0_32 = arith.constant 0 : index
      %c0_33 = arith.constant 0 : index
      %96 = vector.load %arg9[%c0_32, %c0_33] : memref<16x128xf32, #tpu.memory_space<vmem>>, vector<16x128xf32>
      tpu.vector_store %arg9[%c0_32, %c0_33], %95 {strides = array<i32>} : memref<16x128xf32, #tpu.memory_space<vmem>>, vector<16x128xf32>,
      %c0_34 = arith.constant 0 : index
      %c0_35 = arith.constant 0 : index
      %97 = vector.load %arg3[%c0_34, %c0_35] : memref<1x128xf32, #tpu.memory_space<vmem>>, vector<1x128xf32>
      %98 = vector.shape_cast %97 : vector<1x128xf32> to vector<1x128xf32>
      %99 = vector.broadcast %98 : vector<1x128xf32> to vector<16x128xf32>
      %c0_36 = arith.constant 0 : index
      %c0_37 = arith.constant 0 : index
      %100 = vector.load %arg10[%c0_36, %c0_37] : memref<16x128xf32, #tpu.memory_space<vmem>>, vector<16x128xf32>
      tpu.vector_store %arg10[%c0_36, %c0_37], %99 {strides = array<i32>} : memref<16x128xf32, #tpu.memory_space<vmem>>, vector<16x128xf32>,
    } else {
    }
    %c0 = arith.constant 0 : index
    %c0_1 = arith.constant 0 : index
    %3 = vector.load %arg9[%c0, %c0_1] : memref<16x128xf32, #tpu.memory_space<vmem>>, vector<16x128xf32>
    %c0_2 = arith.constant 0 : index
    %c0_3 = arith.constant 0 : index
    %4 = vector.load %arg10[%c0_2, %c0_3] : memref<16x128xf32, #tpu.memory_space<vmem>>, vector<16x128xf32>
    %5 = arith.truncf %3 : vector<16x128xf32> to vector<16x128xbf16>
    %6 = arith.index_cast %arg1 : i32 to index
    %c0_4 = arith.constant 0 : index
    %c0_5 = arith.constant 0 : index
    %7 = vector.load %arg4[%6, %c0_4, %c0_5] : memref<2x128x384xbf16, #tpu.memory_space<vmem>>, vector<1x128x384xbf16>
    %8 = vector.shape_cast %7 : vector<1x128x384xbf16> to vector<128x384xbf16>
    %cst = arith.constant dense<0.000000e+00> : vector<16x384xf32>
    %9 = tpu.matmul %5, %8, %cst {dimension_numbers = #tpu.dot_dimension_numbers<[1], [0], [0], [1], [0, 0, 1, 1], [], []>} : vector<16x128xbf16>, vector<128x384xbf16>, vector<16x384xf32> -> vector<16x384xf32>
    %10 = vector.extract_strided_slice %9 {offsets = [0, 0], sizes = [16, 128], strides = [1, 1]} : vector<16x384xf32> to vector<16x128xf32>
    %11 = vector.extract_strided_slice %9 {offsets = [0, 128], sizes = [16, 128], strides = [1, 1]} : vector<16x384xf32> to vector<16x128xf32>
    %12 = vector.extract_strided_slice %9 {offsets = [0, 256], sizes = [16, 128], strides = [1, 1]} : vector<16x384xf32> to vector<16x128xf32>
    %13 = arith.index_cast %arg1 : i32 to index
    %c0_6 = arith.constant 0 : index
    %c0_7 = arith.constant 0 : index
    %14 = vector.load %arg5[%13, %c0_6, %c0_7] : memref<2x1x128xf32, #tpu.memory_space<vmem>>, vector<1x1x128xf32>
    %15 = vector.shape_cast %14 : vector<1x1x128xf32> to vector<1x128xf32>
    %16 = arith.index_cast %arg1 : i32 to index
    %c0_8 = arith.constant 0 : index
    %c0_9 = arith.constant 0 : index
    %17 = vector.load %arg6[%16, %c0_8, %c0_9] : memref<2x1x128xf32, #tpu.memory_space<vmem>>, vector<1x1x128xf32>
    %18 = vector.shape_cast %17 : vector<1x1x128xf32> to vector<1x128xf32>
    %19 = arith.mulf %11, %12 : vector<16x128xf32>
    %20 = vector.broadcast %15 : vector<1x128xf32> to vector<16x128xf32>
    %21 = arith.mulf %20, %4 : vector<16x128xf32>
    %22 = arith.addf %19, %21 : vector<16x128xf32>
    %23 = tpu.iota {dimensions = array<i32: 1>} : vector<1x128xi32>
    %c8_i32 = arith.constant 8 : i32
    %c0_i32_10 = arith.constant 0 : i32
    %24 = arith.cmpi eq, %c8_i32, %c0_i32_10 : i32
    %c1_i32 = arith.constant 1 : i32
    %25 = arith.select %24, %c1_i32, %c8_i32 : i32
    %26 = vector.broadcast %25 : i32 to vector<1x128xi32>
    %27 = arith.remsi %23, %26 : vector<1x128xi32>
    %c0_i32_11 = arith.constant 0 : i32
    %28 = vector.broadcast %c0_i32_11 : i32 to vector<1x128xi32>
    %29 = arith.cmpi ne, %27, %28 : vector<1x128xi32>
    %c0_i32_12 = arith.constant 0 : i32
    %30 = vector.broadcast %c0_i32_12 : i32 to vector<1x128xi32>
    %31 = arith.cmpi slt, %27, %30 : vector<1x128xi32>
    %c0_i32_13 = arith.constant 0 : i32
    %32 = arith.cmpi slt, %25, %c0_i32_13 : i32
    %33 = vector.broadcast %32 : i1 to vector<1x128xi1>
    %34 = vector.broadcast %33 : vector<1x128xi1> to vector<1x128xi1>
    %35 = arith.xori %31, %34 : vector<1x128xi1>
    %36 = arith.andi %35, %29 : vector<1x128xi1>
    %37 = vector.broadcast %25 : i32 to vector<1x128xi32>
    %38 = arith.addi %27, %37 : vector<1x128xi32>
    %39 = arith.select %36, %38, %27 : vector<1x128xi1>, vector<1x128xi32>
    %c1_i32_14 = arith.constant 1 : i32
    %40 = vector.broadcast %c1_i32_14 : i32 to vector<1x128xi32>
    %41 = arith.cmpi sge, %39, %40 : vector<1x128xi32>
    %42 = arith.extui %41 : vector<1x128xi1> to vector<1x128xi32>
    %43 = arith.sitofp %42 : vector<1x128xi32> to vector<1x128xf32>
    %c1_i32_15 = arith.constant 1 : i32
    %44 = tpu.dynamic_rotate %22 by %c1_i32_15 dim 1 : vector<16x128xf32>, i32 -> vector<16x128xf32>
    %45 = vector.broadcast %43 : vector<1x128xf32> to vector<16x128xf32>
    %46 = arith.mulf %44, %45 : vector<16x128xf32>
    %47 = arith.addf %22, %46 : vector<16x128xf32>
    %c2_i32 = arith.constant 2 : i32
    %48 = vector.broadcast %c2_i32 : i32 to vector<1x128xi32>
    %49 = arith.cmpi sge, %39, %48 : vector<1x128xi32>
    %50 = arith.extui %49 : vector<1x128xi1> to vector<1x128xi32>
    %51 = arith.sitofp %50 : vector<1x128xi32> to vector<1x128xf32>
    %c2_i32_16 = arith.constant 2 : i32
    %52 = tpu.dynamic_rotate %47 by %c2_i32_16 dim 1 : vector<16x128xf32>, i32 -> vector<16x128xf32>
    %53 = vector.broadcast %51 : vector<1x128xf32> to vector<16x128xf32>
    %54 = arith.mulf %52, %53 : vector<16x128xf32>
    %55 = arith.addf %47, %54 : vector<16x128xf32>
    %c4_i32 = arith.constant 4 : i32
    %56 = vector.broadcast %c4_i32 : i32 to vector<1x128xi32>
    %57 = arith.cmpi sge, %39, %56 : vector<1x128xi32>
    %58 = arith.extui %57 : vector<1x128xi1> to vector<1x128xi32>
    %59 = arith.sitofp %58 : vector<1x128xi32> to vector<1x128xf32>
    %c4_i32_17 = arith.constant 4 : i32
    %60 = tpu.dynamic_rotate %55 by %c4_i32_17 dim 1 : vector<16x128xf32>, i32 -> vector<16x128xf32>
    %61 = vector.broadcast %59 : vector<1x128xf32> to vector<16x128xf32>
    %62 = arith.mulf %60, %61 : vector<16x128xf32>
    %63 = arith.addf %55, %62 : vector<16x128xf32>
    %64 = arith.addf %10, %63 : vector<16x128xf32>
    %65 = vector.broadcast %18 : vector<1x128xf32> to vector<16x128xf32>
    %66 = arith.mulf %64, %65 : vector<16x128xf32>
    %67 = arith.addf %66, %3 : vector<16x128xf32>
    %68 = math.tanh %67 : vector<16x128xf32>
    %69 = arith.negf %68 : vector<16x128xf32>
    %70 = math.exp %69 : vector<16x128xf32>
    %cst_18 = arith.constant 1.000000e+00 : f32
    %71 = vector.broadcast %cst_18 : f32 to vector<16x128xf32>
    %72 = arith.addf %71, %70 : vector<16x128xf32>
    %73 = arith.divf %71, %72 : vector<16x128xf32>
    %74 = arith.mulf %68, %73 : vector<16x128xf32>
    %75 = arith.truncf %74 : vector<16x128xf32> to vector<16x128xbf16>
    %76 = arith.index_cast %arg1 : i32 to index
    %c0_19 = arith.constant 0 : index
    %c0_20 = arith.constant 0 : index
    %77 = vector.load %arg7[%76, %c0_19, %c0_20] : memref<2x128x256xbf16, #tpu.memory_space<vmem>>, vector<1x128x256xbf16>
    %78 = vector.shape_cast %77 : vector<1x128x256xbf16> to vector<128x256xbf16>
    %cst_21 = arith.constant dense<0.000000e+00> : vector<16x256xf32>
    %79 = tpu.matmul %75, %78, %cst_21 {dimension_numbers = #tpu.dot_dimension_numbers<[1], [0], [0], [1], [0, 0, 1, 1], [], []>} : vector<16x128xbf16>, vector<128x256xbf16>, vector<16x256xf32> -> vector<16x256xf32>
    %80 = arith.negf %79 : vector<16x256xf32>
    %81 = math.exp %80 : vector<16x256xf32>
    %cst_22 = arith.constant 1.000000e+00 : f32
    %82 = vector.broadcast %cst_22 : f32 to vector<16x256xf32>
    %83 = arith.addf %82, %81 : vector<16x256xf32>
    %84 = arith.divf %82, %83 : vector<16x256xf32>
    %85 = arith.mulf %79, %84 : vector<16x256xf32>
    %86 = arith.truncf %85 : vector<16x256xf32> to vector<16x256xbf16>
    %87 = arith.index_cast %arg1 : i32 to index
    %c0_23 = arith.constant 0 : index
    %c0_24 = arith.constant 0 : index
    %88 = vector.load %arg8[%87, %c0_23, %c0_24] : memref<2x256x128xbf16, #tpu.memory_space<vmem>>, vector<1x256x128xbf16>
    %89 = vector.shape_cast %88 : vector<1x256x128xbf16> to vector<256x128xbf16>
    %cst_25 = arith.constant dense<0.000000e+00> : vector<16x128xf32>
    %90 = tpu.matmul %86, %89, %cst_25 {dimension_numbers = #tpu.dot_dimension_numbers<[1], [0], [0], [1], [0, 0, 1, 1], [], []>} : vector<16x256xbf16>, vector<256x128xbf16>, vector<16x128xf32> -> vector<16x128xf32>
    %91 = arith.addf %90, %68 : vector<16x128xf32>
    %92 = math.tanh %91 : vector<16x128xf32>
    %c0_26 = arith.constant 0 : index
    %c0_27 = arith.constant 0 : index
    %93 = vector.load %arg9[%c0_26, %c0_27] : memref<16x128xf32, #tpu.memory_space<vmem>>, vector<16x128xf32>
    tpu.vector_store %arg9[%c0_26, %c0_27], %92 {strides = array<i32>} : memref<16x128xf32, #tpu.memory_space<vmem>>, vector<16x128xf32>,
    %c0_28 = arith.constant 0 : index
    %c0_29 = arith.constant 0 : index
    %94 = vector.load %arg10[%c0_28, %c0_29] : memref<16x128xf32, #tpu.memory_space<vmem>>, vector<16x128xf32>
    tpu.vector_store %arg10[%c0_28, %c0_29], %63 {strides = array<i32>} : memref<16x128xf32, #tpu.memory_space<vmem>>, vector<16x128xf32>,
    return
  }
  func.func @transform_0(%arg0: i32, %arg1: i32) -> (i32, i32) {
    %c0_i32 = arith.constant 0 : i32
    %c0_i32_0 = arith.constant 0 : i32
    return %arg0, %c0_i32 : i32, i32
  }
  func.func @transform_1(%arg0: i32, %arg1: i32) -> (i32, i32) {
    %c0_i32 = arith.constant 0 : i32
    %c0_i32_0 = arith.constant 0 : i32
    %c0_i32_1 = arith.constant 0 : i32
    return %c0_i32, %c0_i32_0 : i32, i32
  }
  func.func @transform_2(%arg0: i32, %arg1: i32) -> (i32, i32, i32) {
    %c0_i32 = arith.constant 0 : i32
    %c0_i32_0 = arith.constant 0 : i32
    %c0_i32_1 = arith.constant 0 : i32
    %c0_i32_2 = arith.constant 0 : i32
    return %c0_i32, %c0_i32_0, %c0_i32_1 : i32, i32, i32
  }
  func.func @transform_3(%arg0: i32, %arg1: i32) -> (i32, i32, i32) {
    %c0_i32 = arith.constant 0 : i32
    %c0_i32_0 = arith.constant 0 : i32
    %c0_i32_1 = arith.constant 0 : i32
    %c0_i32_2 = arith.constant 0 : i32
    return %c0_i32, %c0_i32_0, %c0_i32_1 : i32, i32, i32
  }
  func.func @transform_4(%arg0: i32, %arg1: i32) -> (i32, i32, i32) {
    %c0_i32 = arith.constant 0 : i32
    %c0_i32_0 = arith.constant 0 : i32
    %c0_i32_1 = arith.constant 0 : i32
    %c0_i32_2 = arith.constant 0 : i32
    return %c0_i32, %c0_i32_0, %c0_i32_1 : i32, i32, i32
  }
  func.func @transform_5(%arg0: i32, %arg1: i32) -> (i32, i32, i32) {
    %c0_i32 = arith.constant 0 : i32
    %c0_i32_0 = arith.constant 0 : i32
    %c0_i32_1 = arith.constant 0 : i32
    %c0_i32_2 = arith.constant 0 : i32
    return %c0_i32, %c0_i32_0, %c0_i32_1 : i32, i32, i32
  }
  func.func @transform_6(%arg0: i32, %arg1: i32) -> (i32, i32, i32) {
    %c0_i32 = arith.constant 0 : i32
    %c0_i32_0 = arith.constant 0 : i32
    %c0_i32_1 = arith.constant 0 : i32
    %c0_i32_2 = arith.constant 0 : i32
    return %c0_i32, %c0_i32_0, %c0_i32_1 : i32, i32, i32
  }
  func.func @transform_7(%arg0: i32, %arg1: i32) -> (i32, i32) {
    %c0_i32 = arith.constant 0 : i32
    %c0_i32_0 = arith.constant 0 : i32
    return %arg0, %c0_i32 : i32, i32
  }
}

</mosaic_0001>

<bundles_post_ra>
// kernel: mhba_mixer_v2_forward.1
= control target key start
LH: loop header
LB: loop body
LE: loop exit
PB: predicated region body
PF: predicated region fallthrough
CT: control target
= control target key end

     0   :  { %12 = vsyncpa [#allocation4], 0  ;;  %s2026_s0 = inlined_call_operand.vmem [shape: f32[16,128], index: 0, kind: input, shape index: {}]   ;;  %s2027_s1 = inlined_call_operand.vmem [shape: f32[1,128], index: 1, kind: input, shape index: {}]   ;;  %s2028_s2 = inlined_call_operand.hbm [shape: bf16[2,128,384], index: 2, kind: input, shape index: {}]   ;;  %s2029_s3 = inlined_call_operand.vmem [shape: f32[2,1,128], index: 3, kind: input, shape index: {}]   ;;  %s2030_s4 = inlined_call_operand.vmem [shape: f32[2,1,128], index: 4, kind: input, shape index: {}]   ;;  %s2031_s5 = inlined_call_operand.hbm [shape: bf16[2,128,256], index: 5, kind: input, shape index: {}]   ;;  %s2032_s6 = inlined_call_operand.hbm [shape: bf16[2,256,128], index: 6, kind: input, shape index: {}]   ;;  %s2033_s7 = inlined_call_operand.vmem [shape: f32[16,128], index: 7, kind: output, shape index: {}]  }
   0x1   :  { %13 = vsyncpa [#allocation6], 0  ;;  %s1743_s24 = smov 0   ;;  %s1745_s25 = smov 0  }
   0x2   :  { %s1747_s26 = smov 0  }
   0x3 LB: > { %s257_s29 = sshll.u32 %s2031_s5, 4  ;;  %s1157_s30 = sadd.s32 4294967295, %s1688_s26   ;;  %s1688_s26 = sphi %s1747_s26, %s19_s26   ;;  %s1684_s25 = sphi %s1745_s25, %s2042_s25   ;;  %s1680_s24 = sphi %s1743_s24, %s2041_s24   ;;  %s258_s29 = int_to_ptr.hbm [resolvable:$true] %s257_s29 }
   0x4   : > { %p1158_p0 = scmp.ge.s32.totalorder %s1688_s26, 1  ;;  %p214_p1 = scmp.lt.s32.totalorder %s1688_s26, 3 }
   0x5   : > { %p1764_p2 = scmp.eq.s32.totalorder %s1157_s30, 0  ;;  %s1690_s10 = smov [#allocation5]  }
   0x6   : > { %p1768_p3 = pnand %p1158_p0, %p214_p1  ;;  %s259_s11 = sshll.u32 %s1690_s10, 4  ;;  %s260_s11 = int_to_ptr.vmem [resolvable:$true] %s259_s11 }
   0x7   : > { %s28_s13 = sadd.s32 1, %s1684_s25  ;;  %s1691_s14 = smov 128  }
   0x8   : > { %p1480_p4 = pneg %p1768_p3  ;;  %p29_p6 = scmp.ge.s32.totalorder %s28_s13, 2 }
   0x9   : > { %s1692_s15 = smov 8   ;;  %s237_s18 = sshll.u32 %s2028_s2, 4  ;;  %s238_s18 = int_to_ptr.hbm [resolvable:$true] %s237_s18 }
   0xa   : > { %p1776_p5 = pnand %p1764_p2, %p1480_p4  ;;  %s2044_s13 = smov (%p29_p6, %s28_s13), 0 }
   0xb   : > { %s1693_s19 = smov [#allocation3]   ;;  %s271_s23 = sshll.u32 %s2032_s6, 4  ;;  %s272_s23 = int_to_ptr.hbm [resolvable:$true] %s271_s23 }
   0xc   : > { %1486 = dma.hbm_to_vmem [thread:$0]  (!%p1776_p5), %s258_s29, 4096, %s260_s11, [#allocation6], %s1691_s14, %s1691_s14, %s1692_s15  }
   0xd   : > { %s239_s20 = sshll.u32 %s1693_s19, 4  ;;  %s1694_s27 = smov 192   ;;  %s240_s20 = int_to_ptr.vmem [resolvable:$true] %s239_s20 }
   0xe   : > { %s1695_s28 = smov 12   ;;  %s1696_s29 = smov [#allocation7]  }
   0xf   : > { %1483 = dma.hbm_to_vmem [thread:$0]  (!%p1776_p5), %s238_s18, 6144, %s240_s20, [#allocation4], %s1694_s27, %s1694_s27, %s1695_s28  }
  0x10   : > { %s273_s30 = sshll.u32 %s1696_s29, 4  ;;  %s1697_s10 = smov 64   ;;  %s274_s30 = int_to_ptr.vmem [resolvable:$true] %s273_s30 }
  0x11   : > { %s1698_s11 = smov 4   ;;  %289 = sbr.rel (%p1768_p3) target bundleno = 915 (0x393), region = 48 }
  0x12   : > { %1489 = dma.hbm_to_vmem [thread:$0]  (!%p1776_p5), %s272_s23, 4096, %s274_s30, [#allocation6], %s1697_s10, %s1697_s10, %s1698_s11  }
  0x16   : > { %1671 = dma.done.wait (%p1764_p2), [#allocation4], 6144  }
  0x17   : > { %1673 = vsyncadd (%p1764_p2), [#allocation4], 4294961152 }
  0x18   : > { %1675 = dma.done.wait (%p1764_p2), [#allocation6], 8192  }
  0x19   : > { %1677 = vsyncadd (%p1764_p2), [#allocation6], 4294959104  ;;  %p1167_p7 = scmp.ne.s32.totalorder %s1680_s24, 0 }
  0x1b   : > { %347 = sbr.rel (%p1167_p7) target bundleno = 37 (0x25), region = 64 }
  0x20   : > { %v348_v0 = vld [vmem:[%s2026_s0] sm:$0xff]  ;;  %v349_v1 = vld [vmem:[%s2026_s0 + $0x8] sm:$0xff] }
  0x21   : > { %350 = vst [vmem:[%s2033_s7] sm:$0xff] %v348_v0  ;;  %v1533_v2 = vld [vmem:[%s2027_s1] ss:$0 sm:$0xff] }
  0x22   : > { %351 = vst [vmem:[%s2033_s7 + $0x8] sm:$0xff] %v349_v1 }
  0x23   : > { %356 = vst [vmem:[#allocation2] sm:$0xff] %v1533_v2 }
  0x24   : > { %357 = vst [vmem:[#allocation2 + $0x8] sm:$0xff] %v1533_v2 }
  0x25 PF: > { %s1409_s21 = smul.u32 192, %s1680_s24  ;;  %s568_s11 = scalar_lea.vmem %s2029_s3, %s1680_s24 }
  0x26   : > { %v1534_v54 = vld [vmem:[%s568_s11] ss:$0 sm:$0xff]  ;;  %s1699_s12 = smov 1   ;;  %s1701_s14 = smov 2  }
  0x27   : > { %s1822_s22 = scalar_lea.vmem [#allocation3], %s1409_s21  ;;  %s570_s16 = scalar_lea.vmem %s2030_s4, %s1680_s24 }
  0x28   : > { %v1431_v3 = vld [vmem:[%s1822_s22 + $0xac] sm:$0xf]  ;;  %v1257_v4 = vld [vmem:[%s1822_s22 + $0xb4] sm:$0xf0]  ;;  %v1263_v5 = vld [vmem:[%s1822_s22 + $0xb0] sm:$0xf] }
  0x29   : > { %v1260_v6 = vor.u32 %v1431_v3, %v1257_v4  ;;  %v1433_v7 = vld [vmem:[%s1822_s22 + $0xb8] sm:$0xf0]  ;;  %v1428_v8 = vld [vmem:[%s1822_s22 + $0x94] sm:$0xf]  ;;  %v1245_v9 = vld [vmem:[%s1822_s22 + $0x9c] sm:$0xf0] }
  0x2a   : > { %v1264_v10 = vor.u32 %v1433_v7, %v1263_v5  ;;  %v1251_v11 = vld [vmem:[%s1822_s22 + $0x98] sm:$0xf]  ;;  %v1430_v12 = vld [vmem:[%s1822_s22 + $0xa0] sm:$0xf0]  ;;  %v1248_v13 = vor.u32 %v1428_v8, %v1245_v9  ;;  %v1425_v15 = vld [vmem:[%s1822_s22 + $0x7c] sm:$0xf]  ;;  %v581_v8 = vlaneseq }
  0x2b   : > { %540 = vmatpush.bf16.msra.mxu1 %v1260_v6  ;;  %v1252_v14 = vor.u32 %v1430_v12, %v1251_v11  ;;  %v1233_v16 = vld [vmem:[%s1822_s22 + $0x84] sm:$0xf0]  ;;  %v1239_v17 = vld [vmem:[%s1822_s22 + $0x80] sm:$0xf]  ;;  %v1427_v18 = vld [vmem:[%s1822_s22 + $0x88] sm:$0xf0] }
  0x2c   : > { %554 = vmatpush.bf16.msra.mxu2 %v1264_v10  ;;  %v1236_v19 = vor.u32 %v1425_v15, %v1233_v16  ;;  %v1240_v20 = vor.u32 %v1427_v18, %v1239_v17  ;;  %v1422_v21 = vld [vmem:[%s1822_s22 + $0x64] sm:$0xf]  ;;  %v1221_v22 = vld [vmem:[%s1822_s22 + $0x6c] sm:$0xf0]  ;;  %v1227_v23 = vld [vmem:[%s1822_s22 + $0x68] sm:$0xf] }
  0x2d   : > { %v1424_v24 = vld [vmem:[%s1822_s22 + $0x70] sm:$0xf0]  ;;  %v1224_v25 = vor.u32 %v1422_v21, %v1221_v22  ;;  %v1419_v27 = vld [vmem:[%s1822_s22 + $0x4c] sm:$0xf]  ;;  %v1209_v28 = vld [vmem:[%s1822_s22 + $0x54] sm:$0xf0] }
  0x2e   : > { %v1228_v26 = vor.u32 %v1424_v24, %v1227_v23  ;;  %v1215_v29 = vld [vmem:[%s1822_s22 + $0x50] sm:$0xf]  ;;  %v1421_v30 = vld [vmem:[%s1822_s22 + $0x58] sm:$0xf0]  ;;  %v1212_v31 = vor.u32 %v1419_v27, %v1209_v28  ;;  %v1416_v33 = vld [vmem:[%s1822_s22 + $0x34] sm:$0xf] }
  0x2f   : > { %541 = vmatpush.bf16.msra.mxu1 %v1248_v13  ;;  %v1216_v32 = vor.u32 %v1421_v30, %v1215_v29  ;;  %v1197_v34 = vld [vmem:[%s1822_s22 + $0x3c] sm:$0xf0]  ;;  %v1203_v35 = vld [vmem:[%s1822_s22 + $0x38] sm:$0xf]  ;;  %v1418_v36 = vld [vmem:[%s1822_s22 + $0x40] sm:$0xf0] }
  0x30   : > { %555 = vmatpush.bf16.msra.mxu2 %v1252_v14  ;;  %v1200_v37 = vor.u32 %v1416_v33, %v1197_v34  ;;  %v1204_v38 = vor.u32 %v1418_v36, %v1203_v35  ;;  %v1413_v39 = vld [vmem:[%s1822_s22 + $0x1c] sm:$0xf]  ;;  %v1185_v40 = vld [vmem:[%s1822_s22 + $0x24] sm:$0xf0]  ;;  %v1191_v41 = vld [vmem:[%s1822_s22 + $0x20] sm:$0xf] }
  0x31   : > { %v1415_v42 = vld [vmem:[%s1822_s22 + $0x28] sm:$0xf0]  ;;  %v1188_v43 = vor.u32 %v1413_v39, %v1185_v40  ;;  %v1410_v45 = vld [vmem:[%s1822_s22 + $0x4] sm:$0xf]  ;;  %v1173_v46 = vld [vmem:[%s1822_s22 + $0xc] sm:$0xf0] }
  0x32   : > { %v1192_v44 = vor.u32 %v1415_v42, %v1191_v41  ;;  %v1179_v47 = vld [vmem:[%s1822_s22 + $0x8] sm:$0xf]  ;;  %v1412_v48 = vld [vmem:[%s1822_s22 + $0x10] sm:$0xf0]  ;;  %v1176_v49 = vor.u32 %v1410_v45, %v1173_v46  ;;  %v1859_v50 = vld [vmem:[%s2033_s7] sm:$0xff]  ;;  %v582_v12 = vand.u32 127, %v581_v8 }
  0x33   : > { %542 = vmatpush.bf16.msra.mxu1 %v1236_v19  ;;  %v1864_v51 = vld [vmem:[%s2033_s7 + $0x8] sm:$0xff]  ;;  %v1180_v52 = vor.u32 %v1412_v48, %v1179_v47  ;;  %v360_v55 = vld [vmem:[#allocation2] sm:$0xff]  ;;  %v1432_v4 = vld [vmem:[%s1822_s22 + $0xb0] sm:$0xf0]  ;;  %v1700_v23 = vmov 0.0   ;;  %s1702_s17 = smov 4  }
  0x34   : > { %556 = vmatpush.bf16.msra.mxu2 %v1240_v20  ;;  %v1868_v53 = vpack.c.bf16 %v1864_v51, %v1859_v50  ;;  %v577_v57 = vmul.f32 %v1534_v54, %v360_v55  ;;  %v361_v61 = vld [vmem:[#allocation2 + $0x8] sm:$0xff]  ;;  %v1243_v5 = vld [vmem:[%s1822_s22 + $0x90] sm:$0xf]  ;;  %v1429_v7 = vld [vmem:[%s1822_s22 + $0x98] sm:$0xf0]  ;;  %v1884_v16 = vand.u32 7, %v582_v12 }
  0x35   : > { %v578_v62 = vmul.f32 %v1534_v54, %v361_v61  ;;  %v1255_v3 = vld [vmem:[%s1822_s22 + $0xa8] sm:$0xf]  ;;  %v1244_v9 = vor.u32 %v1429_v7, %v1243_v5  ;;  %v1231_v10 = vld [vmem:[%s1822_s22 + $0x78] sm:$0xf]  ;;  %v1426_v11 = vld [vmem:[%s1822_s22 + $0x80] sm:$0xf0] }
  0x36   : > { %v1256_v6 = vor.u32 %v1432_v4, %v1255_v3  ;;  %v1232_v13 = vor.u32 %v1426_v11, %v1231_v10  ;;  %v1219_v14 = vld [vmem:[%s1822_s22 + $0x60] sm:$0xf]  ;;  %v1423_v15 = vld [vmem:[%s1822_s22 + $0x68] sm:$0xf0]  ;;  %v1207_v18 = vld [vmem:[%s1822_s22 + $0x48] sm:$0xf] }
  0x37   : > { %543 = vmatpush.bf16.msra.mxu1 %v1224_v25  ;;  %v1220_v17 = vor.u32 %v1423_v15, %v1219_v14  ;;  %v1420_v19 = vld [vmem:[%s1822_s22 + $0x50] sm:$0xf0]  ;;  %vm595_vm0 = vcmp.ge.s32.totalorder %v1884_v16, 1  ;;  %v1195_v21 = vld [vmem:[%s1822_s22 + $0x30] sm:$0xf]  ;;  %vm606_vm1 = vcmp.ge.s32.totalorder %v1884_v16, 2 }
  0x38   : > { %557 = vmatpush.bf16.msra.mxu2 %v1228_v26  ;;  %526 = vmatpush.bf16.msra.mxu0 %v1256_v6  ;;  %v1208_v20 = vor.u32 %v1420_v19, %v1207_v18  ;;  %v1417_v22 = vld [vmem:[%s1822_s22 + $0x38] sm:$0xf0]  ;;  %v1265_v24 = vsel %vm595_vm0, 1.0, %v1700_v23  ;;  %v1183_v28 = vld [vmem:[%s1822_s22 + $0x18] sm:$0xf]  ;;  %s1434_s18 = sshll.u32 %s1680_s24, 7 }
  0x39   : > { %v1196_v26 = vor.u32 %v1417_v22, %v1195_v21  ;;  %v1414_v29 = vld [vmem:[%s1822_s22 + $0x20] sm:$0xf0]  ;;  %v1411_v33 = vld [vmem:[%s1822_s22 + $0x8] sm:$0xf0]  ;;  %s1909_s19 = scalar_lea.vmem [#allocation5], %s1434_s18  ;;  %vm617_vm2 = vcmp.ge.s32.totalorder %v1884_v16, 4 }
  0x3a   : > { %v1330_v45 = vld [vmem:[%s1909_s19 + $0x70] sm:$0xf]  ;;  %v1450_v46 = vld [vmem:[%s1909_s19 + $0x74] sm:$0xf0]  ;;  %v1449_v47 = vld [vmem:[%s1909_s19 + $0x74] sm:$0xf] }
  0x3b   : > { %544 = vmatpush.bf16.msra.mxu1 %v1212_v31  ;;  %v1184_v31 = vor.u32 %v1414_v29, %v1183_v28  ;;  %v1331_v48 = vor.u32 %v1450_v46, %v1330_v45  ;;  %v1447_v55 = vld [vmem:[%s1909_s19 + $0x64] sm:$0xf]  ;;  %v1445_v61 = vld [vmem:[%s1909_s19 + $0x54] sm:$0xf]  ;;  %v1308_v4 = vld [vmem:[%s1909_s19 + $0x48] sm:$0xf0] }
  0x3c   : > { %558 = vmatpush.bf16.msra.mxu2 %v1216_v32  ;;  %527 = vmatpush.bf16.msra.mxu0 %v1244_v9  ;;  %v1171_v32 = vld [vmem:[%s1822_s22] sm:$0xf]  ;;  %v1443_v3 = vld [vmem:[%s1909_s19 + $0x44] sm:$0xf]  ;;  %v1267_v5 = vsel %vm617_vm2, 1.0, %v1700_v23  ;;  %s1963_s21 = scalar_lea.vmem [#allocation7], %s1434_s18 }
  0x3d   : > { %v1172_v35 = vor.u32 %v1411_v33, %v1171_v32  ;;  %779 = vmatpush.bf16.msra.mxu3 %v1331_v48  ;;  %v1311_v7 = vor.u32 %v1443_v3, %v1308_v4  ;;  %v1298_v8 = vld [vmem:[%s1909_s19 + $0x30] sm:$0xf]  ;;  %v1442_v9 = vld [vmem:[%s1909_s19 + $0x34] sm:$0xf0]  ;;  %v1441_v11 = vld [vmem:[%s1909_s19 + $0x34] sm:$0xf] }
  0x3e   : > { %v1300_v12 = vld [vmem:[%s1909_s19 + $0x38] sm:$0xf0]  ;;  %v1299_v15 = vor.u32 %v1442_v9, %v1298_v8  ;;  %v1535_v16 = vld [vmem:[%s570_s16] ss:$0 sm:$0xff]  ;;  %v1439_v21 = vld [vmem:[%s1909_s19 + $0x24] sm:$0xf] }
  0x3f   : > { %545 = vmatpush.bf16.msra.mxu1 %v1200_v37  ;;  %v1303_v18 = vor.u32 %v1441_v11, %v1300_v12  ;;  %v1290_v19 = vld [vmem:[%s1909_s19 + $0x20] sm:$0xf]  ;;  %v1292_v22 = vld [vmem:[%s1909_s19 + $0x28] sm:$0xf0]  ;;  %v1438_v28 = vld [vmem:[%s1909_s19 + $0x14] sm:$0xf0] }
  0x40   : > { %559 = vmatpush.bf16.msra.mxu2 %v1204_v38  ;;  %528 = vmatpush.bf16.msra.mxu0 %v1232_v13  ;;  %v1266_v38 = vsel %vm606_vm1, 1.0, %v1700_v23 }
  0x43   : > { %546 = vmatpush.bf16.msra.mxu1 %v1188_v43 }
  0x44   : > { %560 = vmatpush.bf16.msra.mxu2 %v1192_v44  ;;  %529 = vmatpush.bf16.msra.mxu0 %v1220_v17 }
  0x47   : > { %547 = vmatpush.bf16.msra.mxu1 %v1176_v49  ;;  %v1332_v49 = vld [vmem:[%s1909_s19 + $0x78] sm:$0xf0] }
  0x48   : > { %561 = vmatpush.bf16.msra.mxu2 %v1180_v52  ;;  %530 = vmatpush.bf16.msra.mxu0 %v1208_v20  ;;  %v1322_v52 = vld [vmem:[%s1909_s19 + $0x60] sm:$0xf]  ;;  %v1335_v54 = vor.u32 %v1449_v47, %v1332_v49  ;;  %v1440_v20 = vld [vmem:[%s1909_s19 + $0x24] sm:$0xf0] }
  0x4a   : > { %548 = vmatmul.bf16.vlgmr.msra.gmra.mxu1 %v1868_v53 }
  0x4b   : > { %562 = vmatmul.bf16.vlgmr.msra.gmra.mxu2 %v1868_v53 }
  0x4c   : > { %531 = vmatpush.bf16.msra.mxu0 %v1196_v26  ;;  %v1295_v26 = vor.u32 %v1439_v21, %v1292_v22  ;;  %v1463_v21 = vld [vmem:[%s1963_s21 + $0x58] sm:$0xff]  ;;  %v1456_v22 = vld [vmem:[%s1963_s21 + $0x20] sm:$0xff] }
  0x50   : > { %532 = vmatpush.bf16.msra.mxu0 %v1184_v31  ;;  %v1284_v31 = vld [vmem:[%s1909_s19 + $0x18] sm:$0xf0] }
  0x54   : > { %533 = vmatpush.bf16.msra.mxu0 %v1172_v35 }
  0x57   : > { %534 = vmatmul.bf16.vlgmr.msra.gmra.mxu0 %v1868_v53  ;;  %v1448_v53 = vld [vmem:[%s1909_s19 + $0x64] sm:$0xf0] }
  0x58   : > { %793 = vmatpush.bf16.msrb.mxu0 %v1335_v54 }
  0xc7   : > { %v549_v56 = vpop.f32.mrf.mxu1 }
  0xce   : > { %v563_v58 = vpop.f32.mrf.mxu2 }
  0xcf   : > { %v572_v59 = vmul.f32 %v563_v58, %v549_v56  ;;  %v551_v63 = vpop.f32.mrf.mxu1  ;;  %v1324_v56 = vld [vmem:[%s1909_s19 + $0x68] sm:$0xf0] }
  0xd0   : > { %v1327_v58 = vor.u32 %v1447_v55, %v1324_v56 }
  0xd1   : > { %v579_v60 = vadd.f32 %v577_v57, %v572_v59  ;;  %v1323_v57 = vor.u32 %v1448_v53, %v1322_v52  ;;  %v1314_v59 = vld [vmem:[%s1909_s19 + $0x50] sm:$0xf] }
  0xd2   : > { %794 = vmatpush.bf16.msrb.mxu0 %v1327_v58 }
  0xd3   : > { %598 = vrot.lane.b32.xlu0 %v579_v60, %s1699_s12  ;;  %780 = vmatpush.bf16.msra.mxu3 %v1323_v57 }
  0xd4   : > { %v535_v14 = vpop.f32.mrf.mxu0 }
  0xd6   : > { %v565_v0 = vpop.f32.mrf.mxu2 }
  0xd7   : > { %v573_v1 = vmul.f32 %v565_v0, %v551_v63 }
  0xd9   : > { %v580_v2 = vadd.f32 %v578_v62, %v573_v1  ;;  %v1316_v62 = vld [vmem:[%s1909_s19 + $0x58] sm:$0xf0]  ;;  %v1306_v1 = vld [vmem:[%s1909_s19 + $0x40] sm:$0xf] }
  0xda   : > { %v1319_v0 = vor.u32 %v1445_v61, %v1316_v62 }
  0xdb   : > { %600 = vrot.lane.b32.xlu0 %v580_v2, %s1699_s12 }
  0xdc   : > { %795 = vmatpush.bf16.msrb.mxu0 %v1319_v0 }
  0xe0   : > { %796 = vmatpush.bf16.msrb.mxu0 %v1311_v7 }
  0xe4   : > { %797 = vmatpush.bf16.msrb.mxu0 %v1303_v18  ;;  %v1458_v18 = vld [vmem:[%s1963_s21 + $0x30] sm:$0xff] }
  0xe8   : > { %798 = vmatpush.bf16.msrb.mxu0 %v1295_v26 }
 0x145   : > { %v599_v25 = vpop.permute.xlu0 %598 }
 0x146   : > { %v602_v27 = vmul.f32 %v1265_v24, %v599_v25 }
 0x148   : > { %v604_v30 = vadd.f32 %v602_v27, %v579_v60  ;;  %v1446_v60 = vld [vmem:[%s1909_s19 + $0x54] sm:$0xf0]  ;;  %v1282_v27 = vld [vmem:[%s1909_s19 + $0x10] sm:$0xf] }
 0x149   : > { %v1315_v63 = vor.u32 %v1446_v60, %v1314_v59 }
 0x14a   : > { %609 = vrot.lane.b32.xlu1 %v604_v30, %s1701_s14 }
 0x14b   : > { %781 = vmatpush.bf16.msra.mxu3 %v1315_v63 }
 0x14d   : > { %v601_v34 = vpop.permute.xlu0 %600 }
 0x14e   : > { %v603_v36 = vmul.f32 %v1265_v24, %v601_v34  ;;  %v1291_v24 = vor.u32 %v1440_v20, %v1290_v19  ;;  %v1283_v34 = vor.u32 %v1438_v28, %v1282_v27  ;;  %v1464_v19 = vld [vmem:[%s1963_s21 + $0x60] sm:$0xff]  ;;  %v1457_v20 = vld [vmem:[%s1963_s21 + $0x28] sm:$0xff]  ;;  %v1454_v28 = vld [vmem:[%s1963_s21 + $0x10] sm:$0xff] }
 0x14f   : > { %v1461_v27 = vld [vmem:[%s1963_s21 + $0x48] sm:$0xff] }
 0x150   : > { %v605_v37 = vadd.f32 %v603_v36, %v580_v2  ;;  %v1444_v2 = vld [vmem:[%s1909_s19 + $0x44] sm:$0xf0] }
 0x151   : > { %v1307_v6 = vor.u32 %v1444_v2, %v1306_v1 }
 0x152   : > { %611 = vrot.lane.b32.xlu1 %v605_v37, %s1701_s14 }
 0x153   : > { %782 = vmatpush.bf16.msra.mxu3 %v1307_v6 }
 0x157   : > { %783 = vmatpush.bf16.msra.mxu3 %v1299_v15  ;;  %v1466_v15 = vld [vmem:[%s1963_s21 + $0x70] sm:$0xff] }
 0x15b   : > { %784 = vmatpush.bf16.msra.mxu3 %v1291_v24 }
 0x15f   : > { %785 = vmatpush.bf16.msra.mxu3 %v1283_v34 }
 0x1bc   : > { %v610_v39 = vpop.permute.xlu1 %609 }
 0x1bd   : > { %v613_v40 = vmul.f32 %v1266_v38, %v610_v39  ;;  %v537_v39 = vpop.f32.mrf.mxu0 }
 0x1bf   : > { %v615_v41 = vadd.f32 %v613_v40, %v604_v30  ;;  %v1437_v30 = vld [vmem:[%s1909_s19 + $0x14] sm:$0xf]  ;;  %v1435_v40 = vld [vmem:[%s1909_s19 + $0x4] sm:$0xf] }
 0x1c0   : > { %v1287_v36 = vor.u32 %v1437_v30, %v1284_v31  ;;  %v1460_v30 = vld [vmem:[%s1963_s21 + $0x40] sm:$0xff] }
 0x1c1   : > { %620 = vrot.lane.b32.xlu2 %v615_v41, %s1702_s17 }
 0x1c2   : > { %799 = vmatpush.bf16.msrb.mxu0 %v1287_v36 }
 0x1c4   : > { %v612_v42 = vpop.permute.xlu1 %611 }
 0x1c5   : > { %v614_v43 = vmul.f32 %v1266_v38, %v612_v42  ;;  %v1436_v38 = vld [vmem:[%s1909_s19 + $0x4] sm:$0xf0] }
 0x1c7   : > { %v1903_v44 = vadd.f32 %v614_v43, %v605_v37  ;;  %v1274_v37 = vld [vmem:[%s1909_s19] sm:$0xf] }
 0x1c8   : > { %v1275_v43 = vor.u32 %v1436_v38, %v1274_v37  ;;  %v1452_v37 = vld [vmem:[%s1963_s21] sm:$0xff] }
 0x1c9   : > { %622 = vrot.lane.b32.xlu2 %v1903_v44, %s1702_s17 }
 0x1ca   : > { %786 = vmatpush.bf16.msra.mxu3 %v1275_v43 }
 0x21b   : > { %v621_v10 = vpop.permute.xlu2 %620 }
 0x21c   : > { %v624_v13 = vmul.f32 %v1267_v5, %v621_v10 }
 0x21e   : > { %v626_v17 = vadd.f32 %v624_v13, %v615_v41  ;;  %v1276_v41 = vld [vmem:[%s1909_s19 + $0x8] sm:$0xf0] }
 0x220   : > { %v628_v23 = vadd.f32 %v626_v17, %v535_v14  ;;  %1051 = vst [vmem:[#allocation2] sm:$0xff] %v626_v17  ;;  %v1467_v14 = vld [vmem:[%s1963_s21 + $0x78] sm:$0xff]  ;;  %v1465_v17 = vld [vmem:[%s1963_s21 + $0x68] sm:$0xff] }
 0x221   : > { %1033 = vmatpush.bf16.msrb.mxu2 %v1467_v14 }
 0x222   : > { %v633_v25 = vmul.f32 %v1535_v16, %v628_v23  ;;  %v1462_v23 = vld [vmem:[%s1963_s21 + $0x50] sm:$0xff] }
 0x223   : > { %v623_v29 = vpop.permute.xlu2 %622 }
 0x224   : > { %v635_v32 = vadd.f32 %v633_v25, %v1859_v50  ;;  %v625_v33 = vmul.f32 %v1267_v5, %v623_v29  ;;  %v1279_v50 = vor.u32 %v1435_v40, %v1276_v41  ;;  %v1455_v25 = vld [vmem:[%s1963_s21 + $0x18] sm:$0xff] }
 0x225   : > { %1034 = vmatpush.bf16.msrb.mxu2 %v1466_v15 }
 0x226   : > { %1536 = vtanh.f32 %v635_v32  ;;  %v627_v35 = vadd.f32 %v625_v33, %v1903_v44  ;;  %800 = vmatpush.bf16.msrb.mxu0 %v1279_v50  ;;  %v1453_v33 = vld [vmem:[%s1963_s21 + $0x8] sm:$0xff] }
 0x228   : > { %v629_v42 = vadd.f32 %v627_v35, %v537_v39  ;;  %1052 = vst [vmem:[#allocation2 + $0x8] sm:$0xff] %v627_v35 }
 0x229   : > { %1035 = vmatpush.bf16.msrb.mxu2 %v1465_v17 }
 0x22a   : > { %v634_v45 = vmul.f32 %v1535_v16, %v629_v42  ;;  %v1459_v16 = vld [vmem:[%s1963_s21 + $0x38] sm:$0xff] }
 0x22b   : > { %1019 = vmatpush.bf16.msrb.mxu1 %v1459_v16 }
 0x22c   : > { %v1952_v46 = vpop.eup %1536  ;;  %v636_v47 = vadd.f32 %v634_v45, %v1864_v51 }
 0x22d   : > { %v1268_v44 = vmul.f32 -1.442695, %v1952_v46  ;;  %1036 = vmatpush.bf16.msrb.mxu2 %v1464_v19 }
 0x22e   : > { %1538 = vtanh.f32 %v636_v47 }
 0x22f   : > { %1540 = vpow2.f32 %v1268_v44  ;;  %1020 = vmatpush.bf16.msrb.mxu1 %v1458_v18 }
 0x231   : > { %1037 = vmatpush.bf16.msrb.mxu2 %v1463_v21 }
 0x233   : > { %1021 = vmatpush.bf16.msrb.mxu1 %v1457_v20 }
 0x234   : > { %v1956_v48 = vpop.eup %1538 }
 0x235   : > { %v1541_v49 = vpop.eup %1540  ;;  %v1269_v52 = vmul.f32 -1.442695, %v1956_v48  ;;  %1038 = vmatpush.bf16.msrb.mxu2 %v1462_v23 }
 0x236   : > { %v645_v53 = vadd.f32 1.0, %v1541_v49 }
 0x237   : > { %1542 = vpow2.f32 %v1269_v52  ;;  %1022 = vmatpush.bf16.msrb.mxu1 %v1456_v22 }
 0x238   : > { %1544 = vrcp.f32 %v645_v53  ;;  %v658_v62 = vand.u32 2147483648, %v645_v53  ;;  %vm652_vm4 = vweird.f32 %v645_v53  ;;  %v656_v63 = vand.u32 2147483647, %v645_v53 }
 0x239   : > { %1039 = vmatpush.bf16.msrb.mxu2 %v1461_v27 }
 0x23a   : > { %v659_v5 = vor.u32 1.1754944e-38, %v658_v62  ;;  %vm657_vm7 = vcmp.eq.f32.partialorder %v656_v63, 8.507059e+37 }
 0x23b   : > { %1023 = vmatpush.bf16.msrb.mxu1 %v1455_v25 }
 0x23d   : > { %v1543_v54 = vpop.eup %1542  ;;  %1040 = vmatpush.bf16.msrb.mxu2 %v1460_v30 }
 0x23e   : > { %v1545_v55 = vpop.eup %1544  ;;  %v646_v56 = vadd.f32 1.0, %v1543_v54 }
 0x23f   : > { %v648_v57 = vmul.f32 %v1545_v55, %v645_v53  ;;  %vm653_vm3 = vweird.f32 %v1545_v55  ;;  %1024 = vmatpush.bf16.msrb.mxu1 %v1454_v28 }
 0x240   : > { %1546 = vrcp.f32 %v646_v56  ;;  %vm654_vm5 = vmor %vm652_vm4, %vm653_vm3  ;;  %v673_v1 = vand.u32 2147483648, %v646_v56  ;;  %v671_v4 = vand.u32 2147483647, %v646_v56  ;;  %vm667_vm8 = vweird.f32 %v646_v56 }
 0x241   : > { %v649_v51 = vsub.f32 1.0, %v648_v57 }
 0x242   : > { %v674_v8 = vor.u32 1.1754944e-38, %v673_v1  ;;  %vm672_vm10 = vcmp.eq.f32.partialorder %v671_v4, 8.507059e+37 }
 0x243   : > { %v650_v58 = vmul.f32 %v1545_v55, %v649_v51  ;;  %1025 = vmatpush.bf16.msrb.mxu1 %v1453_v33 }
 0x245   : > { %v651_v60 = vadd.f32 %v1545_v55, %v650_v58 }
 0x246   : > { %v1547_v59 = vpop.eup %1546 }
 0x247   : > { %v663_v61 = vmul.f32 %v1547_v59, %v646_v56  ;;  %v655_v2 = vsel %vm654_vm5, %v1545_v55, %v651_v60  ;;  %vm668_vm6 = vweird.f32 %v1547_v59  ;;  %1026 = vmatpush.bf16.msrb.mxu1 %v1452_v37 }
 0x248   : > { %v660_v7 = vsel %vm657_vm7, %v659_v5, %v655_v2  ;;  %vm669_vm9 = vmor %vm667_vm8, %vm668_vm6 }
 0x249   : > { %v664_v0 = vsub.f32 1.0, %v663_v61  ;;  %v677_v11 = vmul.f32 %v1952_v46, %v660_v7 }
 0x24b   : > { %v665_v3 = vmul.f32 %v1547_v59, %v664_v0 }
 0x24d   : > { %v666_v6 = vadd.f32 %v1547_v59, %v665_v3 }
 0x24f   : > { %v670_v9 = vsel %vm669_vm9, %v1547_v59, %v666_v6 }
 0x250   : > { %v675_v10 = vsel %vm672_vm10, %v674_v8, %v670_v9 }
 0x251   : > { %v678_v12 = vmul.f32 %v1956_v48, %v675_v10 }
 0x253   : > { %v679_v13 = vpack.c.bf16 %v678_v12, %v677_v11 }
 0x255   : > { %787 = vmatmul.bf16.vlgmr.msra.gmra.mxu3 %v679_v13  ;;  %801 = vmatmul.bf16.vlgmr.msrb.gmra.mxu0 %v679_v13 }
 0x2d2   : > { %v1975_v24 = vpop.f32.mrf.mxu0 }
 0x2d3   : > { %v1337_v26 = vmul.f32 -1.442695, %v1975_v24 }
 0x2d5   : > { %1548 = vpow2.f32 %v1337_v26 }
 0x2d8   : > { %v1981_v29 = vpop.f32.mrf.mxu3 }
 0x2d9   : > { %v1336_v31 = vmul.f32 -1.442695, %v1981_v29 }
 0x2da   : > { %v1985_v32 = vpop.f32.mrf.mxu0 }
 0x2db   : > { %v1549_v34 = vpop.eup %1548  ;;  %1550 = vpow2.f32 %v1336_v31  ;;  %v1339_v35 = vmul.f32 -1.442695, %v1985_v32 }
 0x2dc   : > { %v820_v36 = vadd.f32 1.0, %v1549_v34 }
 0x2dd   : > { %1552 = vpow2.f32 %v1339_v35 }
 0x2de   : > { %1554 = vrcp.f32 %v820_v36  ;;  %v847_v56 = vand.u32 2147483647, %v820_v36  ;;  %v849_v59 = vand.u32 2147483648, %v820_v36  ;;  %vm843_vm12 = vweird.f32 %v820_v36 }
 0x2e0   : > { %v1990_v38 = vpop.f32.mrf.mxu3  ;;  %vm848_vm14 = vcmp.eq.f32.partialorder %v847_v56, 8.507059e+37  ;;  %v850_v4 = vor.u32 1.1754944e-38, %v849_v59 }
 0x2e1   : > { %v1551_v39 = vpop.eup %1550  ;;  %v1338_v40 = vmul.f32 -1.442695, %v1990_v38 }
 0x2e2   : > { %v819_v41 = vadd.f32 1.0, %v1551_v39 }
 0x2e3   : > { %v1553_v42 = vpop.eup %1552  ;;  %1556 = vpow2.f32 %v1338_v40 }
 0x2e4   : > { %v1555_v43 = vpop.eup %1554  ;;  %1558 = vrcp.f32 %v819_v41  ;;  %v822_v50 = vadd.f32 1.0, %v1553_v42  ;;  %vm828_vm1 = vweird.f32 %v819_v41  ;;  %v834_v7 = vand.u32 2147483648, %v819_v41 }
 0x2e5   : > { %v839_v45 = vmul.f32 %v1555_v43, %v820_v36  ;;  %vm844_vm11 = vweird.f32 %v1555_v43  ;;  %v832_v10 = vand.u32 2147483647, %v819_v41 }
 0x2e6   : > { %1560 = vrcp.f32 %v822_v50  ;;  %vm1993_vm13 = vmor %vm843_vm12, %vm844_vm11  ;;  %v879_v63 = vand.u32 2147483648, %v822_v50  ;;  %v877_v3 = vand.u32 2147483647, %v822_v50  ;;  %vm873_vm2 = vweird.f32 %v822_v50 }
 0x2e7   : > { %v840_v47 = vsub.f32 1.0, %v839_v45  ;;  %v835_v21 = vor.u32 1.1754944e-38, %v834_v7  ;;  %vm833_vm7 = vcmp.eq.f32.partialorder %v832_v10, 8.507059e+37 }
 0x2e8   : > { %v880_v11 = vor.u32 1.1754944e-38, %v879_v63  ;;  %vm878_vm5 = vcmp.eq.f32.partialorder %v877_v3, 8.507059e+37 }
 0x2e9   : > { %v1557_v44 = vpop.eup %1556  ;;  %v841_v52 = vmul.f32 %v1555_v43, %v840_v47 }
 0x2ea   : > { %v1559_v49 = vpop.eup %1558  ;;  %v821_v53 = vadd.f32 1.0, %v1557_v44 }
 0x2eb   : > { %v824_v54 = vmul.f32 %v1559_v49, %v819_v41  ;;  %v842_v51 = vadd.f32 %v1555_v43, %v841_v52  ;;  %vm829_vm0 = vweird.f32 %v1559_v49 }
 0x2ec   : > { %1562 = vrcp.f32 %v821_v53  ;;  %v1561_v55 = vpop.eup %1560  ;;  %vm1999_vm4 = vmor %vm828_vm1, %vm829_vm0  ;;  %v862_v15 = vand.u32 2147483647, %v821_v53  ;;  %v864_v16 = vand.u32 2147483648, %v821_v53  ;;  %vm858_vm8 = vweird.f32 %v821_v53 }
 0x2ed   : > { %v825_v57 = vsub.f32 1.0, %v824_v54  ;;  %v869_v58 = vmul.f32 %v1561_v55, %v822_v50  ;;  %v846_v1 = vsel %vm1993_vm13, %v1555_v43, %v842_v51  ;;  %vm874_vm15 = vweird.f32 %v1561_v55 }
 0x2ee   : > { %v851_v9 = vsel %vm848_vm14, %v850_v4, %v846_v1  ;;  %vm875_vm3 = vmor %vm873_vm2, %vm874_vm15  ;;  %v865_v27 = vor.u32 1.1754944e-38, %v864_v16  ;;  %vm863_vm10 = vcmp.eq.f32.partialorder %v862_v15, 8.507059e+37 }
 0x2ef   : > { %v826_v60 = vmul.f32 %v1559_v49, %v825_v57  ;;  %v870_v61 = vsub.f32 1.0, %v869_v58  ;;  %v884_v20 = vmul.f32 %v851_v9, %v1975_v24 }
 0x2f1   : > { %v871_v2 = vmul.f32 %v1561_v55, %v870_v61  ;;  %v827_v5 = vadd.f32 %v1559_v49, %v826_v60 }
 0x2f2   : > { %v1563_v0 = vpop.eup %1562 }
 0x2f3   : > { %v854_v6 = vmul.f32 %v1563_v0, %v821_v53  ;;  %v872_v8 = vadd.f32 %v1561_v55, %v871_v2  ;;  %v831_v17 = vsel %vm1999_vm4, %v1559_v49, %v827_v5  ;;  %vm859_vm6 = vweird.f32 %v1563_v0 }
 0x2f4   : > { %v836_v25 = vsel %vm833_vm7, %v835_v21, %v831_v17  ;;  %vm860_vm9 = vmor %vm858_vm8, %vm859_vm6 }
 0x2f5   : > { %v855_v12 = vsub.f32 1.0, %v854_v6  ;;  %v876_v14 = vsel %vm875_vm3, %v1561_v55, %v872_v8  ;;  %v883_v31 = vmul.f32 %v836_v25, %v1981_v29 }
 0x2f6   : > { %v881_v18 = vsel %vm878_vm5, %v880_v11, %v876_v14 }
 0x2f7   : > { %v856_v19 = vmul.f32 %v1563_v0, %v855_v12  ;;  %v886_v22 = vmul.f32 %v881_v18, %v1985_v32 }
 0x2f9   : > { %v857_v23 = vadd.f32 %v1563_v0, %v856_v19  ;;  %v888_v26 = vpack.c.bf16 %v886_v22, %v884_v20 }
 0x2fb   : > { %v861_v28 = vsel %vm860_vm9, %v1563_v0, %v857_v23  ;;  %1041 = vmatmul.bf16.vlgmr.msrb.gmra.mxu2 %v888_v26 }
 0x2fc   : > { %v866_v30 = vsel %vm863_vm10, %v865_v27, %v861_v28 }
 0x2fd   : > { %v885_v33 = vmul.f32 %v866_v30, %v1990_v38 }
 0x2ff   : > { %v887_v34 = vpack.c.bf16 %v885_v33, %v883_v31 }
 0x301   : > { %1027 = vmatmul.bf16.vlgmr.msrb.gmra.mxu1 %v887_v34 }
 0x37e   : > { %v1028_v24 = vpop.f32.mrf.mxu1  ;;  %v1042_v35 = vpop.f32.mrf.mxu2 }
 0x37f   : > { %v1029_v32 = vadd.f32 %v1952_v46, %v1028_v24 }
 0x381   : > { %v1043_v36 = vadd.f32 %v1042_v35, %v1029_v32 }
 0x383   : > { %1564 = vtanh.f32 %v1043_v36 }
 0x386   : > { %v1030_v37 = vpop.f32.mrf.mxu1  ;;  %v1044_v40 = vpop.f32.mrf.mxu2 }
 0x387   : > { %v1031_v39 = vadd.f32 %v1956_v48, %v1030_v37 }
 0x389   : > { %v1565_v41 = vpop.eup %1564  ;;  %v1045_v42 = vadd.f32 %v1044_v40, %v1031_v39 }
 0x38a   : > { %1049 = vst [vmem:[%s2033_s7] sm:$0xff] %v1565_v41 }
 0x38b   : > { %1566 = vtanh.f32 %v1045_v42 }
 0x391   : > { %v1567_v29 = vpop.eup %1566 }
 0x392   : > { %1050 = vst [vmem:[%s2033_s7 + $0x8] sm:$0xff] %v1567_v29 }
 0x393 PF: > { %s19_s26 = sadd.s32 1, %s1688_s26   ;;  %s2041_s24 = smov %s1684_s25 }
 0x394   : > { %p16_p8 = scmp.ge.s32.totalorder %s19_s26, 4   ;;  %s2042_s25 = smov %s2044_s13 }
 0x396   :  { %18 = sbr.rel (!%p16_p8) target bundleno = 3 (0x3), region = 100 }
 0x39b   :  { %1075 = vsyncpa [#allocation4], 1 }
 0x39c   :  { %1077 = vsyncpa [#allocation4 + $0x1], 1 }
 0x39d   :  { %1078 = vsyncpa [#allocation6], 1 }

</bundles_post_ra>
